<compile_context>
chip_gen: v6e
topology: v6e:2x2x1
jax: 0.10.0
libtpu: 0.0.40
codegen_flags: <defaults>
</compile_context>

<pallas_src>
import jax
import jax.numpy as jnp
from jax.experimental import pallas as pl
from jax.experimental.pallas import tpu as pltpu


def _linear_kernel(x_ref, w_ref, b_ref, o_ref):
    # x_ref: (TB, 784), w_ref: (784, 10), b_ref: (1, 10), o_ref: (TB, 10)
    acc = jnp.dot(x_ref[...], w_ref[...], preferred_element_type=jnp.float32)
    o_ref[...] = (acc + b_ref[...]).astype(o_ref.dtype)


def mnist_lr_forward(x_nchw, w_t, b, *, tb=2048):
    """x_nchw: (B, 1, 28, 28) float32; w_t: (784, 10); b: (10,). Returns (B, 10)."""
    B = x_nchw.shape[0]
    in_features, out_features = w_t.shape  # (784, 10)

    # Glue: flatten exactly like nn.Flatten() (NCHW row-major flatten).
    x_flat = x_nchw.reshape(B, in_features)
    b_row = b.reshape(1, out_features)

    # Batch tile selection:
    #  * multiple of 8 (f32 sublane tiling), capped at `tb`;
    #  * when the whole batch would fit in <= 2 tiles, split it in two so the
    #    "parallel" grid axis can use both TensorCores on v7x.
    if B <= 2 * tb:
        TB = max(8, ((pl.cdiv(B, 2) + 7) // 8) * 8)
    else:
        TB = tb
    grid = (pl.cdiv(B, TB),)  # last block may be partial; Pallas masks it.

    cost = pl.CostEstimate(
        flops=2 * B * in_features * out_features,
        transcendentals=0,
        bytes_accessed=(
            B * in_features * 4              # x read (dominant term)
            + in_features * out_features * 4  # weight read (once, resident)
            + out_features * 4                # bias read
            + B * out_features * 4            # output write
        ),
    )

    return pl.pallas_call(
        _linear_kernel,
        out_shape=jax.ShapeDtypeStruct((B, out_features), x_flat.dtype),
        grid_spec=pltpu.PrefetchScalarGridSpec(
            num_scalar_prefetch=0,
            grid=grid,
            in_specs=[
                # x: one batch tile per grid step.
                pl.BlockSpec((TB, in_features), lambda i: (i, 0)),
                # Weight / bias: VMEM-resident (same block every step; Pallas
                # does not re-DMA a constant block index).
                pl.BlockSpec((in_features, out_features), lambda i: (0, 0)),
                pl.BlockSpec((1, out_features), lambda i: (0, 0)),
            ],
            out_specs=pl.BlockSpec((TB, out_features), lambda i: (i, 0)),
        ),
        compiler_params=pltpu.CompilerParams(
            # Batch tiles are independent -> parallel (shards across the two
            # TensorCores on v7x; neutral on v5e/v6e).
            dimension_semantics=("parallel",),
        ),
        cost_estimate=cost,
    )(x_flat, w_t, b_row)


if __name__ == "__main__":
    key = jax.random.PRNGKey(0)
    k_x, k_w, k_b = jax.random.split(key, 3)

    B = 4
    # Input consistent with MnistLR: NCHW (B, 1, 28, 28)
    x = jax.random.normal(k_x, (B, 1, 28, 28), dtype=jnp.float32)

    # Deterministic parameter init (PyTorch Linear(784, 10): weight (10, 784),
    # bias (10,)). Stored transposed as (784, 10) for the kernel.
    in_features, out_features = 28 * 28, 10
    bound = 1.0 / jnp.sqrt(in_features)
    w_t = jax.random.uniform(
        k_w, (in_features, out_features), dtype=jnp.float32, minval=-bound, maxval=bound
    )
    b = jax.random.uniform(
        k_b, (out_features,), dtype=jnp.float32, minval=-bound, maxval=bound
    )

    out = mnist_lr_forward(x, w_t, b)
    out = jax.block_until_ready(out)

    # Sanity check against plain-JAX reference.
    ref = x.reshape(B, in_features) @ w_t + b
    assert out.shape == (B, out_features)
    assert jnp.allclose(out, ref, atol=1e-4, rtol=1e-4)

    print("KERNEL_OK")
</pallas_src>

<mosaic_0001>
module attributes {stable_mosaic.version = 11 : i64} {
  func.func @_linear_kernel(%arg0: i32, %arg1: memref<8x784xf32, #tpu.memory_space<vmem>>, %arg2: memref<784x10xf32, #tpu.memory_space<vmem>>, %arg3: memref<1x10xf32, #tpu.memory_space<vmem>>, %arg4: memref<8x10xf32, #tpu.memory_space<vmem>>) attributes {dimension_semantics = [#tpu.dimension_semantics<parallel>], iteration_bounds = array<i64: 1>, scalar_prefetch = 0 : i64, scratch_operands = 0 : i64, tpu.core_type = #tpu.core_type<tc>, window_params = [{transform_indices = @transform_0, window_bounds = array<i64: 8, 784>}, {pipeline_mode = #tpu.pipeline_mode<synchronous>, transform_indices = @transform_1, window_bounds = array<i64: 784, 10>}, {pipeline_mode = #tpu.pipeline_mode<synchronous>, transform_indices = @transform_2, window_bounds = array<i64: 1, 10>}, {transform_indices = @transform_3, window_bounds = array<i64: 8, 10>}]} {
    %c0 = arith.constant 0 : index
    %c0_0 = arith.constant 0 : index
    %0 = vector.load %arg1[%c0, %c0_0] : memref<8x784xf32, #tpu.memory_space<vmem>>, vector<8x784xf32>
    %c0_1 = arith.constant 0 : index
    %c0_2 = arith.constant 0 : index
    %1 = vector.load %arg2[%c0_1, %c0_2] : memref<784x10xf32, #tpu.memory_space<vmem>>, vector<784x10xf32>
    %cst = arith.constant dense<0.000000e+00> : vector<8x10xf32>
    %2 = tpu.matmul %0, %1, %cst {dimension_numbers = #tpu.dot_dimension_numbers<[1], [0], [0], [1], [0, 0, 1, 1], [], []>} : vector<8x784xf32>, vector<784x10xf32>, vector<8x10xf32> -> vector<8x10xf32>
    %c0_3 = arith.constant 0 : index
    %c0_4 = arith.constant 0 : index
    %3 = vector.load %arg3[%c0_3, %c0_4] : memref<1x10xf32, #tpu.memory_space<vmem>>, vector<1x10xf32>
    %4 = vector.broadcast %3 : vector<1x10xf32> to vector<8x10xf32>
    %5 = arith.addf %2, %4 : vector<8x10xf32>
    %c0_5 = arith.constant 0 : index
    %c0_6 = arith.constant 0 : index
    %6 = vector.load %arg4[%c0_5, %c0_6] : memref<8x10xf32, #tpu.memory_space<vmem>>, vector<8x10xf32>
    tpu.vector_store %arg4[%c0_5, %c0_6], %5 {strides = array<i32>} : memref<8x10xf32, #tpu.memory_space<vmem>>, vector<8x10xf32>,
    return
  }
  func.func @transform_0(%arg0: i32) -> (i32, i32) {
    %c0_i32 = arith.constant 0 : i32
    %c0_i32_0 = arith.constant 0 : i32
    return %arg0, %c0_i32 : i32, i32
  }
  func.func @transform_1(%arg0: i32) -> (i32, i32) {
    %c0_i32 = arith.constant 0 : i32
    %c0_i32_0 = arith.constant 0 : i32
    %c0_i32_1 = arith.constant 0 : i32
    return %c0_i32, %c0_i32_0 : i32, i32
  }
  func.func @transform_2(%arg0: i32) -> (i32, i32) {
    %c0_i32 = arith.constant 0 : i32
    %c0_i32_0 = arith.constant 0 : i32
    %c0_i32_1 = arith.constant 0 : i32
    return %c0_i32, %c0_i32_0 : i32, i32
  }
  func.func @transform_3(%arg0: i32) -> (i32, i32) {
    %c0_i32 = arith.constant 0 : i32
    %c0_i32_0 = arith.constant 0 : i32
    return %arg0, %c0_i32 : i32, i32
  }
}

</mosaic_0001>

<bundles_post_ra>
// kernel: tpu_custom_call.1
= control target key start
LH: loop header
LB: loop body
LE: loop exit
PB: predicated region body
PF: predicated region fallthrough
CT: control target
= control target key end

     0   :  { %8 = vsyncpa [#allocation3], 0  ;;  %vm149_vm0 = vcmask 130048   ;;  %vm605_vm1 = vmmov 0   ;;  %vm432_vm2 = vcmask 80896   ;;  %s950_s0 = inlined_call_operand.vmem [shape: f32[4,784], index: 0, kind: input, shape index: {}]   ;;  %s951_s1 = inlined_call_operand.vmem [shape: f32[784,10], index: 1, kind: input, shape index: {}]   ;;  %s952_s2 = inlined_call_operand.vmem [shape: f32[1,10], index: 2, kind: input, shape index: {}]   ;;  %s953_s3 = inlined_call_operand.hbm [shape: f32[4,10], index: 3, kind: output, shape index: {}]  }
   0x1   :  { %v54_v0 = vld [vmem:[%s951_s1 + $0xf8] sm:$0xff]  ;;  %v53_v2 = vld [vmem:[%s951_s1 + $0xf0] sm:$0xff]  ;;  %v52_v6 = vld [vmem:[%s951_s1 + $0xe8] sm:$0xff] }
   0x2   :  { %v38_v1 = vld [vmem:[%s951_s1 + $0x78] sm:$0xff]  ;;  %452 = vmatprep.subr.mxu0 %v54_v0  ;;  %v37_v4 = vld [vmem:[%s951_s1 + $0x70] sm:$0xff]  ;;  %v36_v8 = vld [vmem:[%s951_s1 + $0x68] sm:$0xff] }
   0x3   :  { %v86_v3 = vld [vmem:[%s951_s1 + $0x1f8] sm:$0xff]  ;;  %453 = vmatpush3.msra.mxu0 %v38_v1  ;;  %v85_v7 = vld [vmem:[%s951_s1 + $0x1f0] sm:$0xff]  ;;  %v51_v10 = vld [vmem:[%s951_s1 + $0xe0] sm:$0xff] }
   0x4   :  { %487 = vmatprep.subr.mxu1 %v86_v3  ;;  %v70_v5 = vld [vmem:[%s951_s1 + $0x178] sm:$0xff]  ;;  %454 = vmatprep.subr.mxu0 %v53_v2  ;;  %v69_v9 = vld [vmem:[%s951_s1 + $0x170] sm:$0xff]  ;;  %v84_v11 = vld [vmem:[%s951_s1 + $0x1e8] sm:$0xff] }
   0x5   :  { %488 = vmatpush3.msra.mxu1 %v70_v5  ;;  %455 = vmatpush3.msra.mxu0 %v37_v4  ;;  %v68_v12 = vld [vmem:[%s951_s1 + $0x168] sm:$0xff]  ;;  %v35_v13 = vld [vmem:[%s951_s1 + $0x60] sm:$0xff]  ;;  %v50_v15 = vld [vmem:[%s951_s1 + $0xd8] sm:$0xff] }
   0x6   :  { %489 = vmatprep.subr.mxu1 %v85_v7  ;;  %456 = vmatprep.subr.mxu0 %v52_v6  ;;  %v83_v14 = vld [vmem:[%s951_s1 + $0x1e0] sm:$0xff]  ;;  %v34_v17 = vld [vmem:[%s951_s1 + $0x58] sm:$0xff]  ;;  %v49_v19 = vld [vmem:[%s951_s1 + $0xd0] sm:$0xff] }
   0x7   :  { %490 = vmatpush3.msra.mxu1 %v69_v9  ;;  %457 = vmatpush3.msra.mxu0 %v36_v8  ;;  %v67_v16 = vld [vmem:[%s951_s1 + $0x160] sm:$0xff]  ;;  %v82_v18 = vld [vmem:[%s951_s1 + $0x1d8] sm:$0xff]  ;;  %v33_v21 = vld [vmem:[%s951_s1 + $0x50] sm:$0xff] }
   0x8   :  { %491 = vmatprep.subr.mxu1 %v84_v11  ;;  %458 = vmatprep.subr.mxu0 %v51_v10  ;;  %v66_v20 = vld [vmem:[%s951_s1 + $0x158] sm:$0xff]  ;;  %v81_v22 = vld [vmem:[%s951_s1 + $0x1d0] sm:$0xff]  ;;  %v48_v23 = vld [vmem:[%s951_s1 + $0xc8] sm:$0xff] }
   0x9   :  { %492 = vmatpush3.msra.mxu1 %v68_v12  ;;  %459 = vmatpush3.msra.mxu0 %v35_v13  ;;  %v65_v24 = vld [vmem:[%s951_s1 + $0x150] sm:$0xff]  ;;  %v32_v25 = vld [vmem:[%s951_s1 + $0x48] sm:$0xff]  ;;  %v47_v27 = vld [vmem:[%s951_s1 + $0xc0] sm:$0xff]  ;;  %v604_v13 = vmov 0.0  }
   0xa   :  { %493 = vmatprep.subr.mxu1 %v83_v14  ;;  %460 = vmatprep.subr.mxu0 %v50_v15  ;;  %v80_v26 = vld [vmem:[%s951_s1 + $0x1c8] sm:$0xff]  ;;  %v31_v29 = vld [vmem:[%s951_s1 + $0x40] sm:$0xff]  ;;  %v46_v31 = vld [vmem:[%s951_s1 + $0xb8] sm:$0xff] }
   0xb   :  { %494 = vmatpush3.msra.mxu1 %v67_v16  ;;  %461 = vmatpush3.msra.mxu0 %v34_v17  ;;  %v64_v28 = vld [vmem:[%s951_s1 + $0x148] sm:$0xff]  ;;  %v79_v30 = vld [vmem:[%s951_s1 + $0x1c0] sm:$0xff]  ;;  %v30_v33 = vld [vmem:[%s951_s1 + $0x38] sm:$0xff] }
   0xc   :  { %495 = vmatprep.subr.mxu1 %v82_v18  ;;  %462 = vmatprep.subr.mxu0 %v49_v19  ;;  %v63_v32 = vld [vmem:[%s951_s1 + $0x140] sm:$0xff]  ;;  %v78_v34 = vld [vmem:[%s951_s1 + $0x1b8] sm:$0xff]  ;;  %v45_v35 = vld [vmem:[%s951_s1 + $0xb0] sm:$0xff] }
   0xd   :  { %496 = vmatpush3.msra.mxu1 %v66_v20  ;;  %463 = vmatpush3.msra.mxu0 %v33_v21  ;;  %v62_v36 = vld [vmem:[%s951_s1 + $0x138] sm:$0xff]  ;;  %v29_v37 = vld [vmem:[%s951_s1 + $0x30] sm:$0xff]  ;;  %v44_v39 = vld [vmem:[%s951_s1 + $0xa8] sm:$0xff] }
   0xe   :  { %497 = vmatprep.subr.mxu1 %v81_v22  ;;  %464 = vmatprep.subr.mxu0 %v48_v23  ;;  %v77_v38 = vld [vmem:[%s951_s1 + $0x1b0] sm:$0xff]  ;;  %v28_v41 = vld [vmem:[%s951_s1 + $0x28] sm:$0xff]  ;;  %v43_v43 = vld [vmem:[%s951_s1 + $0xa0] sm:$0xff] }
   0xf   :  { %498 = vmatpush3.msra.mxu1 %v65_v24  ;;  %465 = vmatpush3.msra.mxu0 %v32_v25  ;;  %v61_v40 = vld [vmem:[%s951_s1 + $0x130] sm:$0xff]  ;;  %v76_v42 = vld [vmem:[%s951_s1 + $0x1a8] sm:$0xff]  ;;  %v27_v45 = vld [vmem:[%s951_s1 + $0x20] sm:$0xff] }
  0x10   :  { %499 = vmatprep.subr.mxu1 %v80_v26  ;;  %466 = vmatprep.subr.mxu0 %v47_v27  ;;  %v60_v44 = vld [vmem:[%s951_s1 + $0x128] sm:$0xff]  ;;  %v75_v46 = vld [vmem:[%s951_s1 + $0x1a0] sm:$0xff]  ;;  %v42_v47 = vld [vmem:[%s951_s1 + $0x98] sm:$0xff] }
  0x11   :  { %500 = vmatpush3.msra.mxu1 %v64_v28  ;;  %467 = vmatpush3.msra.mxu0 %v31_v29  ;;  %v26_v48 = vld [vmem:[%s951_s1 + $0x18] sm:$0xff]  ;;  %v59_v49 = vld [vmem:[%s951_s1 + $0x120] sm:$0xff]  ;;  %v41_v51 = vld [vmem:[%s951_s1 + $0x90] sm:$0xff] }
  0x12   :  { %501 = vmatprep.subr.mxu1 %v79_v30  ;;  %468 = vmatprep.subr.mxu0 %v46_v31  ;;  %v74_v50 = vld [vmem:[%s951_s1 + $0x198] sm:$0xff]  ;;  %v25_v53 = vld [vmem:[%s951_s1 + $0x10] sm:$0xff]  ;;  %v40_v55 = vld [vmem:[%s951_s1 + $0x88] sm:$0xff] }
  0x13   :  { %502 = vmatpush3.msra.mxu1 %v63_v32  ;;  %469 = vmatpush3.msra.mxu0 %v30_v33  ;;  %v58_v52 = vld [vmem:[%s951_s1 + $0x118] sm:$0xff]  ;;  %v73_v54 = vld [vmem:[%s951_s1 + $0x190] sm:$0xff]  ;;  %v24_v57 = vld [vmem:[%s951_s1 + $0x8] sm:$0xff] }
  0x14   :  { %503 = vmatprep.subr.mxu1 %v78_v34  ;;  %470 = vmatprep.subr.mxu0 %v45_v35  ;;  %v57_v56 = vld [vmem:[%s951_s1 + $0x110] sm:$0xff]  ;;  %v72_v58 = vld [vmem:[%s951_s1 + $0x188] sm:$0xff]  ;;  %v574_v59 = vld [vmem:[%s950_s0 + $0x4] ss:$28 sps:$4 sm:$0xff]  }
  0x15   :  { %504 = vmatpush3.msra.mxu1 %v62_v36  ;;  %471 = vmatpush3.msra.mxu0 %v29_v37  ;;  %v39_v60 = vld [vmem:[%s951_s1 + $0x80] sm:$0xff]  ;;  %v56_v63 = vld [vmem:[%s951_s1 + $0x108] sm:$0xff]  ;;  %v118_v1 = vld [vmem:[%s951_s1 + $0x2f8] sm:$0xff] }
  0x16   :  { %505 = vmatprep.subr.mxu1 %v77_v38  ;;  %472 = vmatprep.subr.mxu0 %v44_v39  ;;  %v23_v61 = vld [vmem:[%s951_s1] sm:$0xff]  ;;  %v577_v3 = vld [vmem:[%s950_s0 + $0xc] ss:$28 sps:$4 sm:$0xff]   ;;  %v102_v5 = vld [vmem:[%s951_s1 + $0x278] sm:$0xff] }
  0x17   :  { %506 = vmatpush3.msra.mxu1 %v61_v40  ;;  %473 = vmatpush3.msra.mxu0 %v28_v41  ;;  %v572_v62 = vld [vmem:[%s950_s0] ss:$28 sps:$4 sm:$0xff]   ;;  %v575_v4 = vld [vmem:[%s950_s0 + $0x8] ss:$28 sps:$4 sm:$0xff]   ;;  %v117_v6 = vld [vmem:[%s951_s1 + $0x2f0] sm:$0xff] }
  0x18   :  { %507 = vmatprep.subr.mxu1 %v76_v42  ;;  %474 = vmatprep.subr.mxu0 %v43_v43  ;;  %v71_v0 = vld [vmem:[%s951_s1 + $0x180] sm:$0xff]  ;;  %v101_v7 = vld [vmem:[%s951_s1 + $0x270] sm:$0xff]  ;;  %v116_v8 = vld [vmem:[%s951_s1 + $0x2e8] sm:$0xff] }
  0x19   :  { %508 = vmatpush3.msra.mxu1 %v60_v44  ;;  %475 = vmatpush3.msra.mxu0 %v27_v45  ;;  %v55_v2 = vld [vmem:[%s951_s1 + $0x100] sm:$0xff]  ;;  %v100_v9 = vld [vmem:[%s951_s1 + $0x268] sm:$0xff]  ;;  %v580_v10 = vld [vmem:[%s950_s0 + $0x14] ss:$28 sps:$4 sm:$0xff]  }
  0x1a   :  { %509 = vmatprep.subr.mxu1 %v75_v46  ;;  %476 = vmatprep.subr.mxu0 %v42_v47  ;;  %v120_v11 = vld [vmem:[%s951_s1 + $0x308] sm:$0xff]  ;;  %v115_v12 = vld [vmem:[%s951_s1 + $0x2e0] sm:$0xff]  ;;  %v114_v16 = vld [vmem:[%s951_s1 + $0x2d8] sm:$0xff] }
  0x1b   :  { %510 = vmatpush3.msra.mxu1 %v59_v49  ;;  %477 = vmatpush3.msra.mxu0 %v26_v48  ;;  %v99_v14 = vld [vmem:[%s951_s1 + $0x260] sm:$0xff]  ;;  %v581_v17 = vld [vmem:[%s950_s0 + $0x18] ss:$28 sps:$4 sm:$0xff]   ;;  %v112_v21 = vld [vmem:[%s951_s1 + $0x2c8] sm:$0xff] }
  0x1c   :  { %511 = vmatprep.subr.mxu1 %v74_v50  ;;  %478 = vmatprep.subr.mxu0 %v41_v51  ;;  %v119_v15 = vld [vmem:[%s951_s1 + $0x300] sm:$0xff]  ;;  %v98_v18 = vld [vmem:[%s951_s1 + $0x258] sm:$0xff]  ;;  %v113_v19 = vld [vmem:[%s951_s1 + $0x2d0] sm:$0xff] }
  0x1d   :  { %512 = vmatpush3.msra.mxu1 %v58_v52  ;;  %479 = vmatpush3.msra.mxu0 %v25_v53  ;;  %v97_v20 = vld [vmem:[%s951_s1 + $0x250] sm:$0xff]  ;;  %v96_v22 = vld [vmem:[%s951_s1 + $0x248] sm:$0xff]  ;;  %v111_v23 = vld [vmem:[%s951_s1 + $0x2c0] sm:$0xff] }
  0x1e   :  { %513 = vmatprep.subr.mxu1 %v73_v54  ;;  %480 = vmatprep.subr.mxu0 %v40_v55  ;;  %v95_v24 = vld [vmem:[%s951_s1 + $0x240] sm:$0xff]  ;;  %v110_v25 = vld [vmem:[%s951_s1 + $0x2b8] sm:$0xff]  ;;  %v109_v27 = vld [vmem:[%s951_s1 + $0x2b0] sm:$0xff] }
  0x1f   :  { %514 = vmatpush3.msra.mxu1 %v57_v56  ;;  %481 = vmatpush3.msra.mxu0 %v24_v57  ;;  %v94_v26 = vld [vmem:[%s951_s1 + $0x238] sm:$0xff]  ;;  %v93_v28 = vld [vmem:[%s951_s1 + $0x230] sm:$0xff]  ;;  %v108_v29 = vld [vmem:[%s951_s1 + $0x2a8] sm:$0xff] }
  0x20   :  { %515 = vmatprep.subr.mxu1 %v72_v58  ;;  %482 = vmatprep.subr.mxu0 %v39_v60  ;;  %v92_v30 = vld [vmem:[%s951_s1 + $0x228] sm:$0xff]  ;;  %v107_v31 = vld [vmem:[%s951_s1 + $0x2a0] sm:$0xff]  ;;  %v106_v33 = vld [vmem:[%s951_s1 + $0x298] sm:$0xff] }
  0x21   :  { %216 = vmatprep.mubr.f32.mxu0 %v574_v59  ;;  %483 = vmatpush3.msra.mxu0 %v23_v61  ;;  %v91_v32 = vld [vmem:[%s951_s1 + $0x220] sm:$0xff]  ;;  %v90_v34 = vld [vmem:[%s951_s1 + $0x218] sm:$0xff]  ;;  %v105_v35 = vld [vmem:[%s951_s1 + $0x290] sm:$0xff] }
  0x22   :  { %516 = vmatpush3.msra.mxu1 %v56_v63  ;;  %217 = vmatmul.mubr.f32.vlgmr.msra.gmra.mxu0 %v572_v62  ;;  %v89_v36 = vld [vmem:[%s951_s1 + $0x210] sm:$0xff]  ;;  %v104_v37 = vld [vmem:[%s951_s1 + $0x288] sm:$0xff]  ;;  %v103_v39 = vld [vmem:[%s951_s1 + $0x280] sm:$0xff] }
  0x23   :  { %517 = vmatprep.subr.mxu1 %v71_v0  ;;  %522 = vmatprep.subr.mxu0 %v118_v1  ;;  %v88_v38 = vld [vmem:[%s951_s1 + $0x208] sm:$0xff]  ;;  %v87_v40 = vld [vmem:[%s951_s1 + $0x200] sm:$0xff] }
  0x24   :  { %518 = vmatpush3.msra.mxu1 %v55_v2  ;;  %286 = vmatprep.mubr.f32.mxu1 %v577_v3  ;;  %v578_v41 = vld [vmem:[%s950_s0 + $0x10] ss:$28 sps:$4 sm:$0xff]   ;;  %v450_v49 = vld [vmem:[%s952_s2] ss:$0 sm:$0xff] }
  0x25   :  { %523 = vmatpush3.msra.mxu0 %v102_v5  ;;  %287 = vmatmul.mubr.f32.vlgmr.msra.gmra.mxu1 %v575_v4 }
  0x26   :  { %524 = vmatprep.subr.mxu0 %v117_v6  ;;  %560 = vmatprep.subr.mxu1 %v604_v13 }
  0x27   :  { %525 = vmatpush3.msra.mxu0 %v101_v7  ;;  %356 = vmatprep.mubr.f32.mxu0 %v580_v10 }
  0x28   :  { %526 = vmatprep.subr.mxu0 %v116_v8  ;;  %561 = vmatpush3.msra.mxu1 %v120_v11 }
  0x29   :  { %527 = vmatpush3.msra.mxu0 %v100_v9  ;;  %562 = vmatprep.subr.mxu1 %v604_v13 }
  0x2a   :  { %528 = vmatprep.subr.mxu0 %v115_v12  ;;  %563 = vmatpush3.msra.mxu1 %v119_v15 }
  0x2b   :  { %529 = vmatpush3.msra.mxu0 %v99_v14  ;;  %564 = vmatprep.mubr.msk.f32.mxu1 %vm605_vm1, %v604_v13 }
  0x2c   :  { %530 = vmatprep.subr.mxu0 %v114_v16  ;;  %565 = vmatmul.mubr.msk.f32.vlgmr.msra.gmra.mxu1 %vm149_vm0, %v581_v17 }
  0x2d   :  { %531 = vmatpush3.msra.mxu0 %v98_v18 }
  0x2e   :  { %532 = vmatprep.subr.mxu0 %v113_v19 }
  0x2f   :  { %533 = vmatpush3.msra.mxu0 %v97_v20 }
  0x30   :  { %534 = vmatprep.subr.mxu0 %v112_v21 }
  0x31   :  { %535 = vmatpush3.msra.mxu0 %v96_v22 }
  0x32   :  { %536 = vmatprep.subr.mxu0 %v111_v23 }
  0x33   :  { %537 = vmatpush3.msra.mxu0 %v95_v24 }
  0x34   :  { %538 = vmatprep.subr.mxu0 %v110_v25 }
  0x35   :  { %539 = vmatpush3.msra.mxu0 %v94_v26 }
  0x36   :  { %540 = vmatprep.subr.mxu0 %v109_v27 }
  0x37   :  { %541 = vmatpush3.msra.mxu0 %v93_v28 }
  0x38   :  { %542 = vmatprep.subr.mxu0 %v108_v29 }
  0x39   :  { %543 = vmatpush3.msra.mxu0 %v92_v30 }
  0x3a   :  { %544 = vmatprep.subr.mxu0 %v107_v31 }
  0x3b   :  { %545 = vmatpush3.msra.mxu0 %v91_v32 }
  0x3c   :  { %546 = vmatprep.subr.mxu0 %v106_v33 }
  0x3d   :  { %547 = vmatpush3.msra.mxu0 %v90_v34 }
  0x3e   :  { %548 = vmatprep.subr.mxu0 %v105_v35 }
  0x3f   :  { %549 = vmatpush3.msra.mxu0 %v89_v36 }
  0x40   :  { %550 = vmatprep.subr.mxu0 %v104_v37 }
  0x41   :  { %551 = vmatpush3.msra.mxu0 %v88_v38 }
  0x42   :  { %552 = vmatprep.subr.mxu0 %v103_v39 }
  0x43   :  { %553 = vmatpush3.msra.mxu0 %v87_v40 }
  0x44   :  { %357 = vmatmul.mubr.f32.vlgmr.msra.gmra.mxu0 %v578_v41 }
  0xe2   :  { %v484_v46 = vpop.f32.mrf.mxu0 }
  0xe4   :  { %v485_v47 = vpop.f32.mrf.mxu0 }
  0xe5   :  { %v519_v42 = vpop.f32.mrf.mxu1  ;;  %v486_v48 = vadd.f32 %v485_v47, %v484_v46 }
  0xe7   :  { %v520_v43 = vpop.f32.mrf.mxu1  ;;  %v219_v50 = vadd.f32 %v486_v48, %v450_v49 }
  0xe8   :  { %v521_v51 = vadd.f32 %v520_v43, %v519_v42 }
  0xea   :  { %v289_v54 = vadd.f32 %v521_v51, %v219_v50 }
  0xec   :  { %v428_v44 = vpop.f32.mrf.mxu1 }
  0xee   :  { %v566_v45 = vpop.f32.mrf.mxu1 }
 0x104   :  { %v554_v52 = vpop.f32.mrf.mxu0 }
 0x106   :  { %v555_v53 = vpop.f32.mrf.mxu0 }
 0x107   :  { %v556_v55 = vadd.f32 %v555_v53, %v554_v52 }
 0x109   :  { %v359_v56 = vadd.f32 %v556_v55, %v289_v54 }
 0x10b   :  { %v429_v57 = vadd.f32 %v428_v44, %v359_v56 }
 0x10d   :  { %433 = vst.msk [vmem:[#allocation2] sm:$0xff] %vm432_vm2, %v429_v57 }
 0x10e   :  { %438 = vsyncadd [#allocation3], 64  ;;  %s606_s0 = smov [#allocation2]  }
 0x10f   :  { %s439_s1 = sshll.u32 %s606_s0, 4  ;;  %s440_s1 = int_to_ptr.vmem [resolvable:$true] %s439_s1 }
 0x110   :  { %s582_s8 = scalar_lea.vmem %s440_s1, 64  ;;  %s586_s9 = scalar_lea.vmem %s440_s1, 128 }
 0x111   :  { %p583_p0 = scmp.ne.s32.totalorder %s440_s1, %s582_s8  ;;  %p587_p1 = scmp.lt.s32.totalorder %s440_s1, %s440_s1 }
 0x112   :  { %p588_p2 = scmp.lt.s32.totalorder %s586_s9, %s582_s8 }
 0x114   :  { %p589_p3 = por %p588_p2, %p587_p1 }
 0x116   :  { %p590_p4 = pnand %p589_p3, %p583_p0 }
 0x118   :  { %593 = shalt.err (!%p590_p4)
}
 0x119   :  { %s607_s2 = smov 64   ;;  %s608_s10 = smov 4  }
 0x11a   :  { %445 = dma.vmem_to_hbm [thread:$0]  %s440_s1, 64, %s953_s3, [#allocation3], %s607_s2, %s607_s2, %s608_s10  }
 0x11b   :  { %602 = dma.done.wait [#allocation3], 128  }
 0x11c   :  { %603 = vsyncadd [#allocation3], 4294967168 }
 0x11d   :  { %449 = vsyncpa [#allocation3], 1 }

</bundles_post_ra>
